<compile_context>
chip_gen: v5e
topology: v5e:2x2
jax: 0.10.0
libtpu: 0.0.40
codegen_flags: <defaults>
</compile_context>

<pallas_src>
import functools

import jax
import jax.numpy as jnp
from jax.experimental import pallas as pl
from jax.experimental.pallas import tpu as pltpu


def _occnet_kernel(samp_ref,                 # (1, 3, T)  transposed sample coords
                   w_in_ref, b_in_ref,       # (1, F, 3), (1, F, 1)  CBN1-folded fc1
                   w_r1_ref, b_r1_ref,       # (1, F, F), (1, F, 1)  CBN2-folded resnet.fc1
                   w_r2_ref, b_r2_ref,       # (F, F),    (F, 1)     resnet.fc2 (shared)
                   w_out_ref, c_out_ref,     # (1, F, 1), (1, 1, 1)  CBN3-folded fc2
                   out_ref):                 # (1, 1, T)
    x = samp_ref[0]                          # (3, T)

    # fc1 (+CBN1 folded): (F, 3) @ (3, T). K=3 is too small for the MXU to be
    # useful, so expand it as three lane-dense VPU FMAs instead.
    w_in = w_in_ref[0]                                          # (F, 3)
    h = (w_in[:, 0:1] * x[0:1, :]
         + w_in[:, 1:2] * x[1:2, :]
         + w_in[:, 2:3] * x[2:3, :]
         + b_in_ref[0])                                         # (F, T) = post-CBN1
    res = h                                                     # residual source

    # relu -> resnet.fc1 (+CBN2 folded, per-batch weights)
    h = jnp.maximum(h, 0.0)
    h = jnp.dot(w_r1_ref[0], h,
                preferred_element_type=jnp.float32) + b_r1_ref[0]

    # relu -> resnet.fc2 -> residual add
    h = jnp.maximum(h, 0.0)
    h = jnp.dot(w_r2_ref[...], h,
                preferred_element_type=jnp.float32) + b_r2_ref[...]
    h = res + h

    # fc2 (+CBN3 folded): F -> 1 as a sublane reduction (keeps output lane-dense).
    v = jnp.sum(w_out_ref[0] * h, axis=0, keepdims=True) + c_out_ref[0]   # (1, T)
    out_ref[...] = v[None].astype(out_ref.dtype)


def _choose_tile_n(n):
    # Block last dim must be a multiple of 128 or equal to the full dim.
    if n % 128 != 0:
        return n
    return min(n, 2048)


def occnet_decoder_forward(embedding, samples, params, *, tile_n=None):
    """embedding: (B, F) float32; samples: (B, N, 3) float32 -> (B, N, 1)."""
    B, F = embedding.shape
    _, N, _ = samples.shape
    hp = jax.lax.Precision.HIGHEST

    # ---- Hoisted prologue (tiny XLA ops): one batched matmul for all six
    # beta/gamma projections, fold running stats into scale/shift, then fold
    # each scale/shift into the neighboring linear layer.
    w_cat = jnp.concatenate([params['bn1_wb'], params['bn1_wg'],
                             params['bn2_wb'], params['bn2_wg'],
                             params['bn3_wb'], params['bn3_wg']], axis=0)   # (6F, F)
    b_cat = jnp.concatenate([params['bn1_bb'], params['bn1_bg'],
                             params['bn2_bb'], params['bn2_bg'],
                             params['bn3_bb'], params['bn3_bg']], axis=0)   # (6F,)
    bg_all = jnp.dot(embedding, w_cat.T, precision=hp) + b_cat              # (B, 6F)
    beta1, gamma1, beta2, gamma2, beta3, gamma3 = jnp.split(bg_all, 6, axis=1)

    def scale_shift(gamma, beta, rm, rv):
        inv = jax.lax.rsqrt(rv[0] + 1e-5)
        scale = gamma * inv                 # (B, F)
        shift = beta - rm[0] * scale        # (B, F)
        return scale, shift

    s1, t1 = scale_shift(gamma1, beta1, params['bn1_rm'], params['bn1_rv'])
    s2, t2 = scale_shift(gamma2, beta2, params['bn2_rm'], params['bn2_rv'])
    s3, t3 = scale_shift(gamma3, beta3, params['bn3_rm'], params['bn3_rv'])

    # CBN1 ∘ fc1 :  s1 ⊙ (W_in x + b_in) + t1  ==  (s1⊙rows W_in) x + (s1 b_in + t1)
    w_in_b = s1[:, :, None] * params['fc1_w'][None, :, :]                   # (B, F, 3)
    b_in_b = (s1 * params['fc1_b'][None, :] + t1)[:, :, None]               # (B, F, 1)

    # CBN2 ∘ resnet.fc1 : same fold, per-batch (F,F) weight
    w_r1_b = s2[:, :, None] * params['rfc1_w'][None, :, :]                  # (B, F, F)
    b_r1_b = (s2 * params['rfc1_b'][None, :] + t2)[:, :, None]              # (B, F, 1)

    # fc2 ∘ CBN3 :  W_fc2 (s3⊙h + t3) + b  ==  (W_fc2⊙s3) h + (W_fc2·t3 + b)
    w_out = params['fc2_w'].reshape(F)                                      # (F,)
    w_out_b = (w_out[None, :] * s3)[:, :, None]                             # (B, F, 1)
    c_out_b = (jnp.sum(w_out[None, :] * t3, axis=1)
               + params['fc2_b'][0]).reshape(B, 1, 1)                       # (B, 1, 1)

    # Shared resnet.fc2 params.
    b_r2 = params['rfc2_b'].reshape(F, 1)

    # ---- Lane-dense layout: put the large N axis on lanes.
    samples_t = jnp.swapaxes(samples, 1, 2)                                 # (B, 3, N)

    if tile_n is None:
        tile_n = _choose_tile_n(N)
    assert tile_n == N or (tile_n % 128 == 0 and N % tile_n == 0), \
        "tile_n must be lane-dense and divide N, or equal N"
    n_tiles = pl.cdiv(N, tile_n)

    grid_spec = pltpu.PrefetchScalarGridSpec(
        num_scalar_prefetch=0,
        grid=(B, n_tiles),
        in_specs=[
            pl.BlockSpec((1, 3, tile_n), lambda b, n: (b, 0, n)),   # samples (transposed)
            pl.BlockSpec((1, F, 3), lambda b, n: (b, 0, 0)),        # fc1.W  (CBN1 folded)
            pl.BlockSpec((1, F, 1), lambda b, n: (b, 0, 0)),        # fc1.b  (CBN1 folded)
            pl.BlockSpec((1, F, F), lambda b, n: (b, 0, 0)),        # resnet.fc1.W (CBN2 folded)
            pl.BlockSpec((1, F, 1), lambda b, n: (b, 0, 0)),        # resnet.fc1.b (CBN2 folded)
            pl.BlockSpec((F, F), lambda b, n: (0, 0)),              # resnet.fc2.W
            pl.BlockSpec((F, 1), lambda b, n: (0, 0)),              # resnet.fc2.b
            pl.BlockSpec((1, F, 1), lambda b, n: (b, 0, 0)),        # fc2.W  (CBN3 folded)
            pl.BlockSpec((1, 1, 1), lambda b, n: (b, 0, 0)),        # fc2.b  (CBN3 folded)
        ],
        out_specs=pl.BlockSpec((1, 1, tile_n), lambda b, n: (b, 0, n)),
    )

    out = pl.pallas_call(
        _occnet_kernel,
        out_shape=jax.ShapeDtypeStruct((B, 1, N), samples.dtype),
        grid_spec=grid_spec,
        compiler_params=pltpu.CompilerParams(
            dimension_semantics=("parallel", "parallel"),
            vmem_limit_bytes=32 * 1024 * 1024,
        ),
    )(samples_t,
      w_in_b, b_in_b,
      w_r1_b, b_r1_b,
      params['rfc2_w'], b_r2,
      w_out_b, c_out_b)

    # (B, 1, N) -> (B, N, 1): pure metadata reshape (singleton move), free.
    return out.reshape(B, N, 1)


def _reference(embedding, samples, p):
    """Pure-JAX reference of the PyTorch eval-mode forward."""
    hp = jax.lax.Precision.HIGHEST

    def lin(x, w, b):
        return jnp.dot(x, w.T, precision=hp) + b

    def cbn(emb, s, wb, bb, wg, bg, rm, rv):
        beta = lin(emb, wb, bb)
        gamma = lin(emb, wg, bg)
        norm = (s - rm[0]) / jnp.sqrt(rv[0] + 1e-5)
        return gamma[:, None, :] * norm + beta[:, None, :]

    h = lin(samples, p['fc1_w'], p['fc1_b'])
    h = cbn(embedding, h, p['bn1_wb'], p['bn1_bb'], p['bn1_wg'], p['bn1_bg'],
            p['bn1_rm'], p['bn1_rv'])
    res = h
    h = jnp.maximum(h, 0.0)
    h = lin(h, p['rfc1_w'], p['rfc1_b'])
    h = cbn(embedding, h, p['bn2_wb'], p['bn2_bb'], p['bn2_wg'], p['bn2_bg'],
            p['bn2_rm'], p['bn2_rv'])
    h = jnp.maximum(h, 0.0)
    h = lin(h, p['rfc2_w'], p['rfc2_b'])
    h = res + h
    h = cbn(embedding, h, p['bn3_wb'], p['bn3_bb'], p['bn3_wg'], p['bn3_bg'],
            p['bn3_rm'], p['bn3_rv'])
    return lin(h, p['fc2_w'], p['fc2_b'])


def init_params(key, f_dim):
    """Deterministic PyTorch-style Linear init (uniform ±1/sqrt(fan_in))."""
    def uniform(k, shape, fan_in):
        bound = 1.0 / (fan_in ** 0.5)
        return jax.random.uniform(k, shape, jnp.float32, -bound, bound)

    ks = iter(jax.random.split(key, 24))
    p = {}
    # OccNetDecoder.fc1 : Linear(3, F)
    p['fc1_w'] = uniform(next(ks), (f_dim, 3), 3)
    p['fc1_b'] = uniform(next(ks), (f_dim,), 3)
    # CBN layers: resnet.bn1 -> bn1, resnet.bn2 -> bn2, decoder.bn -> bn3
    for name in ('bn1', 'bn2', 'bn3'):
        p[f'{name}_wb'] = uniform(next(ks), (f_dim, f_dim), f_dim)
        p[f'{name}_bb'] = uniform(next(ks), (f_dim,), f_dim)
        p[f'{name}_wg'] = uniform(next(ks), (f_dim, f_dim), f_dim)
        p[f'{name}_bg'] = uniform(next(ks), (f_dim,), f_dim)
    # Running stats are (1,)-shaped buffers; use non-trivial values to exercise
    # the scale/shift folding (construction defaults would be 0 / 1).
    p['bn1_rm'] = jnp.array([0.05], jnp.float32)
    p['bn1_rv'] = jnp.array([1.20], jnp.float32)
    p['bn2_rm'] = jnp.array([-0.03], jnp.float32)
    p['bn2_rv'] = jnp.array([0.90], jnp.float32)
    p['bn3_rm'] = jnp.array([0.10], jnp.float32)
    p['bn3_rv'] = jnp.array([1.05], jnp.float32)
    # resnet.fc1 / resnet.fc2 : Linear(F, F)
    p['rfc1_w'] = uniform(next(ks), (f_dim, f_dim), f_dim)
    p['rfc1_b'] = uniform(next(ks), (f_dim,), f_dim)
    p['rfc2_w'] = uniform(next(ks), (f_dim, f_dim), f_dim)
    p['rfc2_b'] = uniform(next(ks), (f_dim,), f_dim)
    # OccNetDecoder.fc2 : Linear(F, 1)
    p['fc2_w'] = uniform(next(ks), (1, f_dim), f_dim)
    p['fc2_b'] = uniform(next(ks), (1,), f_dim)
    return p


if __name__ == "__main__":
    F_DIM = 32     # f_dim
    B = 2          # batch
    N = 512        # sample points per batch element -> one lane-dense tile/batch

    key = jax.random.PRNGKey(0)
    kp, ke, ks = jax.random.split(key, 3)
    params = init_params(kp, F_DIM)
    embedding = jax.random.normal(ke, (B, F_DIM), jnp.float32)
    samples = jax.random.normal(ks, (B, N, 3), jnp.float32)

    fwd = jax.jit(functools.partial(occnet_decoder_forward))
    out = jax.block_until_ready(fwd(embedding, samples, params))

    ref = _reference(embedding, samples, params)

    assert out.shape == (B, N, 1)
    max_err = float(jnp.max(jnp.abs(out - ref)))
    assert jnp.allclose(out, ref, atol=5e-4, rtol=5e-4), f"max abs err {max_err}"
    print("KERNEL_OK")
</pallas_src>

<mosaic_0001>
module attributes {stable_mosaic.version = 11 : i64} {
  func.func @_occnet_kernel(%arg0: i32, %arg1: i32, %arg2: memref<1x3x512xf32, #tpu.memory_space<vmem>>, %arg3: memref<1x32x3xf32, #tpu.memory_space<vmem>>, %arg4: memref<1x32x1xf32, #tpu.memory_space<vmem>>, %arg5: memref<1x32x32xf32, #tpu.memory_space<vmem>>, %arg6: memref<1x32x1xf32, #tpu.memory_space<vmem>>, %arg7: memref<32x32xf32, #tpu.memory_space<vmem>>, %arg8: memref<32x1xf32, #tpu.memory_space<vmem>>, %arg9: memref<1x32x1xf32, #tpu.memory_space<vmem>>, %arg10: memref<1x1x1xf32, #tpu.memory_space<vmem>>, %arg11: memref<1x1x512xf32, #tpu.memory_space<vmem>>) attributes {dimension_semantics = [#tpu.dimension_semantics<parallel>, #tpu.dimension_semantics<parallel>], iteration_bounds = array<i64: 2, 1>, scalar_prefetch = 0 : i64, scratch_operands = 0 : i64, tpu.core_type = #tpu.core_type<tc>, window_params = [{transform_indices = @transform_0, window_bounds = array<i64: 1, 3, 512>}, {transform_indices = @transform_1, window_bounds = array<i64: 1, 32, 3>}, {transform_indices = @transform_2, window_bounds = array<i64: 1, 32, 1>}, {transform_indices = @transform_3, window_bounds = array<i64: 1, 32, 32>}, {transform_indices = @transform_4, window_bounds = array<i64: 1, 32, 1>}, {pipeline_mode = #tpu.pipeline_mode<synchronous>, transform_indices = @transform_5, window_bounds = array<i64: 32, 32>}, {pipeline_mode = #tpu.pipeline_mode<synchronous>, transform_indices = @transform_6, window_bounds = array<i64: 32, 1>}, {transform_indices = @transform_7, window_bounds = array<i64: 1, 32, 1>}, {transform_indices = @transform_8, window_bounds = array<i64: 1, 1, 1>}, {transform_indices = @transform_9, window_bounds = array<i64: 1, 1, 512>}]} {
    %c0 = arith.constant 0 : index
    %c0_0 = arith.constant 0 : index
    %c0_1 = arith.constant 0 : index
    %0 = vector.load %arg2[%c0, %c0_0, %c0_1] : memref<1x3x512xf32, #tpu.memory_space<vmem>>, vector<1x3x512xf32>
    %1 = vector.shape_cast %0 : vector<1x3x512xf32> to vector<3x512xf32>
    %c0_2 = arith.constant 0 : index
    %c0_3 = arith.constant 0 : index
    %c0_4 = arith.constant 0 : index
    %2 = vector.load %arg3[%c0_2, %c0_3, %c0_4] : memref<1x32x3xf32, #tpu.memory_space<vmem>>, vector<1x32x3xf32>
    %3 = vector.shape_cast %2 : vector<1x32x3xf32> to vector<32x3xf32>
    %4 = vector.extract_strided_slice %3 {offsets = [0, 0], sizes = [32, 1], strides = [1, 1]} : vector<32x3xf32> to vector<32x1xf32>
    %5 = vector.extract_strided_slice %1 {offsets = [0, 0], sizes = [1, 512], strides = [1, 1]} : vector<3x512xf32> to vector<1x512xf32>
    %6 = vector.broadcast %4 : vector<32x1xf32> to vector<32x512xf32>
    %7 = vector.broadcast %5 : vector<1x512xf32> to vector<32x512xf32>
    %8 = arith.mulf %6, %7 : vector<32x512xf32>
    %9 = vector.extract_strided_slice %3 {offsets = [0, 1], sizes = [32, 1], strides = [1, 1]} : vector<32x3xf32> to vector<32x1xf32>
    %10 = vector.extract_strided_slice %1 {offsets = [1, 0], sizes = [1, 512], strides = [1, 1]} : vector<3x512xf32> to vector<1x512xf32>
    %11 = vector.broadcast %9 : vector<32x1xf32> to vector<32x512xf32>
    %12 = vector.broadcast %10 : vector<1x512xf32> to vector<32x512xf32>
    %13 = arith.mulf %11, %12 : vector<32x512xf32>
    %14 = arith.addf %8, %13 : vector<32x512xf32>
    %15 = vector.extract_strided_slice %3 {offsets = [0, 2], sizes = [32, 1], strides = [1, 1]} : vector<32x3xf32> to vector<32x1xf32>
    %16 = vector.extract_strided_slice %1 {offsets = [2, 0], sizes = [1, 512], strides = [1, 1]} : vector<3x512xf32> to vector<1x512xf32>
    %17 = vector.broadcast %15 : vector<32x1xf32> to vector<32x512xf32>
    %18 = vector.broadcast %16 : vector<1x512xf32> to vector<32x512xf32>
    %19 = arith.mulf %17, %18 : vector<32x512xf32>
    %20 = arith.addf %14, %19 : vector<32x512xf32>
    %c0_5 = arith.constant 0 : index
    %c0_6 = arith.constant 0 : index
    %c0_7 = arith.constant 0 : index
    %21 = vector.load %arg4[%c0_5, %c0_6, %c0_7] : memref<1x32x1xf32, #tpu.memory_space<vmem>>, vector<1x32x1xf32>
    %22 = vector.shape_cast %21 : vector<1x32x1xf32> to vector<32x1xf32>
    %23 = vector.broadcast %22 : vector<32x1xf32> to vector<32x512xf32>
    %24 = arith.addf %20, %23 : vector<32x512xf32>
    %cst = arith.constant 0.000000e+00 : f32
    %25 = vector.broadcast %cst : f32 to vector<32x512xf32>
    %26 = arith.maximumf %24, %25 : vector<32x512xf32>
    %c0_8 = arith.constant 0 : index
    %c0_9 = arith.constant 0 : index
    %c0_10 = arith.constant 0 : index
    %27 = vector.load %arg5[%c0_8, %c0_9, %c0_10] : memref<1x32x32xf32, #tpu.memory_space<vmem>>, vector<1x32x32xf32>
    %28 = vector.shape_cast %27 : vector<1x32x32xf32> to vector<32x32xf32>
    %cst_11 = arith.constant dense<0.000000e+00> : vector<32x512xf32>
    %29 = tpu.matmul %28, %26, %cst_11 {dimension_numbers = #tpu.dot_dimension_numbers<[1], [0], [0], [1], [0, 0, 1, 1], [], []>} : vector<32x32xf32>, vector<32x512xf32>, vector<32x512xf32> -> vector<32x512xf32>
    %c0_12 = arith.constant 0 : index
    %c0_13 = arith.constant 0 : index
    %c0_14 = arith.constant 0 : index
    %30 = vector.load %arg6[%c0_12, %c0_13, %c0_14] : memref<1x32x1xf32, #tpu.memory_space<vmem>>, vector<1x32x1xf32>
    %31 = vector.shape_cast %30 : vector<1x32x1xf32> to vector<32x1xf32>
    %32 = vector.broadcast %31 : vector<32x1xf32> to vector<32x512xf32>
    %33 = arith.addf %29, %32 : vector<32x512xf32>
    %cst_15 = arith.constant 0.000000e+00 : f32
    %34 = vector.broadcast %cst_15 : f32 to vector<32x512xf32>
    %35 = arith.maximumf %33, %34 : vector<32x512xf32>
    %c0_16 = arith.constant 0 : index
    %c0_17 = arith.constant 0 : index
    %36 = vector.load %arg7[%c0_16, %c0_17] : memref<32x32xf32, #tpu.memory_space<vmem>>, vector<32x32xf32>
    %cst_18 = arith.constant dense<0.000000e+00> : vector<32x512xf32>
    %37 = tpu.matmul %36, %35, %cst_18 {dimension_numbers = #tpu.dot_dimension_numbers<[1], [0], [0], [1], [0, 0, 1, 1], [], []>} : vector<32x32xf32>, vector<32x512xf32>, vector<32x512xf32> -> vector<32x512xf32>
    %c0_19 = arith.constant 0 : index
    %c0_20 = arith.constant 0 : index
    %38 = vector.load %arg8[%c0_19, %c0_20] : memref<32x1xf32, #tpu.memory_space<vmem>>, vector<32x1xf32>
    %39 = vector.broadcast %38 : vector<32x1xf32> to vector<32x512xf32>
    %40 = arith.addf %37, %39 : vector<32x512xf32>
    %41 = arith.addf %24, %40 : vector<32x512xf32>
    %c0_21 = arith.constant 0 : index
    %c0_22 = arith.constant 0 : index
    %c0_23 = arith.constant 0 : index
    %42 = vector.load %arg9[%c0_21, %c0_22, %c0_23] : memref<1x32x1xf32, #tpu.memory_space<vmem>>, vector<1x32x1xf32>
    %43 = vector.shape_cast %42 : vector<1x32x1xf32> to vector<32x1xf32>
    %44 = vector.broadcast %43 : vector<32x1xf32> to vector<32x512xf32>
    %45 = arith.mulf %44, %41 : vector<32x512xf32>
    %cst_24 = arith.constant dense<0.000000e+00> : vector<512xf32>
    %46 = vector.multi_reduction <add>, %45, %cst_24 [0] : vector<32x512xf32> to vector<512xf32>
    %47 = vector.shape_cast %46 : vector<512xf32> to vector<1x512xf32>
    %c0_25 = arith.constant 0 : index
    %c0_26 = arith.constant 0 : index
    %c0_27 = arith.constant 0 : index
    %48 = vector.load %arg10[%c0_25, %c0_26, %c0_27] : memref<1x1x1xf32, #tpu.memory_space<vmem>>, vector<1x1x1xf32>
    %49 = vector.shape_cast %48 : vector<1x1x1xf32> to vector<1x1xf32>
    %50 = vector.broadcast %49 : vector<1x1xf32> to vector<1x512xf32>
    %51 = arith.addf %47, %50 : vector<1x512xf32>
    %52 = vector.shape_cast %51 : vector<1x512xf32> to vector<1x1x512xf32>
    %c0_28 = arith.constant 0 : index
    %c0_29 = arith.constant 0 : index
    %c0_30 = arith.constant 0 : index
    %53 = vector.load %arg11[%c0_28, %c0_29, %c0_30] : memref<1x1x512xf32, #tpu.memory_space<vmem>>, vector<1x1x512xf32>
    tpu.vector_store %arg11[%c0_28, %c0_29, %c0_30], %52 {strides = array<i32>} : memref<1x1x512xf32, #tpu.memory_space<vmem>>, vector<1x1x512xf32>,
    return
  }
  func.func @transform_0(%arg0: i32, %arg1: i32) -> (i32, i32, i32) {
    %c0_i32 = arith.constant 0 : i32
    %c0_i32_0 = arith.constant 0 : i32
    return %arg0, %c0_i32, %arg1 : i32, i32, i32
  }
  func.func @transform_1(%arg0: i32, %arg1: i32) -> (i32, i32, i32) {
    %c0_i32 = arith.constant 0 : i32
    %c0_i32_0 = arith.constant 0 : i32
    %c0_i32_1 = arith.constant 0 : i32
    return %arg0, %c0_i32, %c0_i32_0 : i32, i32, i32
  }
  func.func @transform_2(%arg0: i32, %arg1: i32) -> (i32, i32, i32) {
    %c0_i32 = arith.constant 0 : i32
    %c0_i32_0 = arith.constant 0 : i32
    %c0_i32_1 = arith.constant 0 : i32
    return %arg0, %c0_i32, %c0_i32_0 : i32, i32, i32
  }
  func.func @transform_3(%arg0: i32, %arg1: i32) -> (i32, i32, i32) {
    %c0_i32 = arith.constant 0 : i32
    %c0_i32_0 = arith.constant 0 : i32
    %c0_i32_1 = arith.constant 0 : i32
    return %arg0, %c0_i32, %c0_i32_0 : i32, i32, i32
  }
  func.func @transform_4(%arg0: i32, %arg1: i32) -> (i32, i32, i32) {
    %c0_i32 = arith.constant 0 : i32
    %c0_i32_0 = arith.constant 0 : i32
    %c0_i32_1 = arith.constant 0 : i32
    return %arg0, %c0_i32, %c0_i32_0 : i32, i32, i32
  }
  func.func @transform_5(%arg0: i32, %arg1: i32) -> (i32, i32) {
    %c0_i32 = arith.constant 0 : i32
    %c0_i32_0 = arith.constant 0 : i32
    %c0_i32_1 = arith.constant 0 : i32
    return %c0_i32, %c0_i32_0 : i32, i32
  }
  func.func @transform_6(%arg0: i32, %arg1: i32) -> (i32, i32) {
    %c0_i32 = arith.constant 0 : i32
    %c0_i32_0 = arith.constant 0 : i32
    %c0_i32_1 = arith.constant 0 : i32
    return %c0_i32, %c0_i32_0 : i32, i32
  }
  func.func @transform_7(%arg0: i32, %arg1: i32) -> (i32, i32, i32) {
    %c0_i32 = arith.constant 0 : i32
    %c0_i32_0 = arith.constant 0 : i32
    %c0_i32_1 = arith.constant 0 : i32
    return %arg0, %c0_i32, %c0_i32_0 : i32, i32, i32
  }
  func.func @transform_8(%arg0: i32, %arg1: i32) -> (i32, i32, i32) {
    %c0_i32 = arith.constant 0 : i32
    %c0_i32_0 = arith.constant 0 : i32
    %c0_i32_1 = arith.constant 0 : i32
    return %arg0, %c0_i32, %c0_i32_0 : i32, i32, i32
  }
  func.func @transform_9(%arg0: i32, %arg1: i32) -> (i32, i32, i32) {
    %c0_i32 = arith.constant 0 : i32
    %c0_i32_0 = arith.constant 0 : i32
    return %arg0, %c0_i32, %arg1 : i32, i32, i32
  }
}

</mosaic_0001>

<bundles_post_ra>
// kernel: occnet_decoder_forward.1
= control target key start
LH: loop header
LB: loop body
LE: loop exit
PB: predicated region body
PF: predicated region fallthrough
CT: control target
= control target key end

     0   :  { %s1901_s0 = inlined_call_operand.vmem [shape: f32[2,3,512], index: 0, kind: input, shape index: {}]   ;;  %s1902_s1 = inlined_call_operand.vmem [shape: f32[2,32,3], index: 1, kind: input, shape index: {}]   ;;  %s1903_s2 = inlined_call_operand.vmem [shape: f32[2,32,1], index: 2, kind: input, shape index: {}]   ;;  %s1904_s3 = inlined_call_operand.vmem [shape: f32[2,32,32], index: 3, kind: input, shape index: {}]   ;;  %s1905_s4 = inlined_call_operand.vmem [shape: f32[2,32,1], index: 4, kind: input, shape index: {}]   ;;  %s1906_s5 = inlined_call_operand.vmem [shape: f32[32,32], index: 5, kind: input, shape index: {}]   ;;  %s1907_s6 = inlined_call_operand.vmem [shape: f32[32,1], index: 6, kind: input, shape index: {}]   ;;  %s1908_s7 = inlined_call_operand.vmem [shape: f32[2,32,1], index: 7, kind: input, shape index: {}]   ;;  %s1909_s8 = inlined_call_operand.vmem [shape: f32[2,1,1], index: 8, kind: input, shape index: {}]   ;;  %s1910_s9 = inlined_call_operand.hbm [shape: f32[2,1,512], index: 9, kind: output, shape index: {}]  }
   0x1   :  { %1911 = sst [smem:[#allocation5_spill]] %s1902_s1 }
   0x2   :  { %14 = vsyncpa [#allocation3], 0 }
   0x3   :  { %16 = vsyncpa [#allocation3 + $0x1], 0  ;;  %s1581_s30 = smov 0   ;;  %s1583_s10 = smov 0  }
   0x4   :  { %s1585_s11 = smov 0   ;;  %s1587_s12 = smov 0  }
   0x5   :  { %s1589_s13 = smov 0   ;;  %s1591_s14 = smov 0  }
   0x6 LB: > { %s1321_s15 = sadd.s32 4294967295, %s1526_s14   ;;  %s1322_s16 = sadd.s32 4294967294, %s1526_s14   ;;  %s1526_s14 = sphi %s1591_s14, %s22_s14   ;;  %s1522_s13 = sphi %s1589_s13, %s1919_s13   ;;  %s1518_s12 = sphi %s1587_s12, %s1918_s12   ;;  %s1514_s11 = sphi %s1585_s11, %s1917_s11   ;;  %s1510_s10 = sphi %s1583_s10, %s1916_s10   ;;  %s1506_s30 = sphi %s1581_s30, %s1915_s30  }
   0x7   : > { %s34_s17 = sadd.s32 1, %s1522_s13  ;;  %s269_s18 = sadd.s32 1, %s1514_s11 }
   0x8   : > { %p36_p0 = scmp.ge.s32.totalorder %s34_s17, 2  ;;  %p279_p1 = scmp.ne.s32.totalorder %s1514_s11, %s1510_s10 }
   0x9   : > { %p280_p2 = scmp.eq.s32.totalorder %s1321_s15, 1  ;;  %p285_p3 = scmp.ne.s32.totalorder %s1510_s10, %s1506_s30 }
   0xa   : > { %s1921_s17 = smov (%p36_p0, %s34_s17), 0  ;;  %p286_p5 = scmp.eq.s32.totalorder %s1322_s16, 1 }
   0xb   : > { %p1621_p4 = por %p280_p2, %p279_p1  ;;  %s264_s20 = ssub.s32 %s1522_s13, %s1921_s17 }
   0xc   : > { %p1325_p6 = scmp.ge.s32.totalorder %s1526_s14, 1  ;;  %p267_p7 = scmp.eq.s32.totalorder %s264_s20, 0 }
   0xd   : > { %p1628_p8 = por %p286_p5, %p285_p3  ;;  %p369_p9 = scmp.lt.s32.totalorder %s1526_s14, 3 }
   0xe   : > { %s1634_s22 = scalar_select %p267_p7, %s1514_s11, %s269_s18  }
   0xf   : > { %p370_p10 = pnand %p1325_p6, %p369_p9 }
  0x10   : > { %p438_p11 = scmp.lt.s32.totalorder (!%p370_p10), %s1518_s12, 1  ;;  %s1914_s1 = sld [smem:[#allocation5_spill]] (!%p370_p10) }
  0x11   : > { %373 = sbr.rel (%p370_p10) target bundleno = 546 (0x222), region = 56 }
  0x16   : > { %v1528_v0 = vmov 2   ;;  %v1529_v1 = vmov 1   ;;  %v1530_v2 = vmov 0   ;;  %s1638_s23 = scalar_select %p438_p11, %s1518_s12, 1  ;;  %v887_v13 = vld [vmem:[%s1907_s6 + $0x10] sm:$0xff]  ;;  %v885_v17 = vld [vmem:[%s1907_s6] sm:$0xff] }
  0x17   : > { %1443 = vset.pattern.permute.xlu2 %v1528_v0  ;;  %1439 = vset.pattern.permute.xlu0 %v1529_v1  ;;  %v886_v18 = vld [vmem:[%s1907_s6 + $0x8] sm:$0xff]  ;;  %v888_v20 = vld [vmem:[%s1907_s6 + $0x18] sm:$0xff]  ;;  %vm736_vm0 = vcmask 261120   ;;  %vm1147_vm1 = vcmask 1040384   ;;  %vm1149_vm2 = vcmask 1042434   ;;  %vm1151_vm3 = vcmask 1041408  }
  0x18   : > { %1441 = vset.pattern.permute.xlu1 %v1530_v2  ;;  %s1641_s24 = sshll.u32 %s1638_s23, 5  ;;  %s474_s26 = scalar_lea.vmem %s1909_s8, %s1638_s23 }
  0x19   : > { %s451_s27 = scalar_lea.vmem %s1914_s1, %s1641_s24  ;;  %s456_s15 = scalar_lea.vmem %s1903_s2, %s1641_s24  ;;  %v1129_v19 = vld [vmem:[%s474_s26] sm:$0x1] }
  0x1a   : > { %v481_v3 = vld [vmem:[%s451_s27 + $0x18] sm:$0xff]  ;;  %v480_v4 = vld [vmem:[%s451_s27 + $0x10] sm:$0xff]  ;;  %v479_v5 = vld [vmem:[%s451_s27 + $0x8] sm:$0xff]  ;;  %s466_s20 = scalar_lea.vmem %s1905_s4, %s1641_s24  ;;  %s471_s29 = scalar_lea.vmem %s1908_s7, %s1641_s24 }
  0x1b   : > { %605 = vperm.xlu2 %1443, %v481_v3   ;;  %545 = vperm.xlu0 %1439, %v481_v3   ;;  %v478_v6 = vld [vmem:[%s451_s27] sm:$0xff]  ;;  %v654_v7 = vld [vmem:[%s456_s15 + $0x10] sm:$0xff]  ;;  %v715_v8 = vld [vmem:[%s466_s20 + $0x18] sm:$0xff]  ;;  %s1375_s1 = sshll.u32 %s1638_s23, 4  ;;  %s461_s25 = scalar_lea.vmem %s1904_s3, %s1641_s24 }
  0x1c   : > { %494 = vperm.xlu1 %1441, %v480_v4   ;;  %v655_v9 = vld [vmem:[%s456_s15 + $0x18] sm:$0xff]  ;;  %v712_v10 = vld [vmem:[%s466_s20] sm:$0xff]  ;;  %v653_v11 = vld [vmem:[%s456_s15 + $0x8] sm:$0xff]  ;;  %s445_s18 = scalar_lea.vmem %s1901_s0, %s1375_s1 }
  0x1d   : > { %v652_v12 = vld [vmem:[%s456_s15] sm:$0xff]  ;;  %v714_v14 = vld [vmem:[%s466_s20 + $0x10] sm:$0xff]  ;;  %v713_v15 = vld [vmem:[%s466_s20 + $0x8] sm:$0xff] }
  0x1e   : > { %v1054_v16 = vld [vmem:[%s471_s29 + $0x8] sm:$0xff]  ;;  %v1053_v21 = vld [vmem:[%s471_s29] sm:$0xff]  ;;  %v1055_v22 = vld [vmem:[%s471_s29 + $0x10] sm:$0xff] }
  0x1f   : > { %v1056_v23 = vld [vmem:[%s471_s29 + $0x18] sm:$0xff]  ;;  %v476_v29 = vld [vmem:[%s445_s18] sm:$0x77]  ;;  %v477_v30 = vld [vmem:[%s445_s18 + $0x8] sm:$0x77]  ;;  %s434_s18 = sand.u32 1, %s1510_s10  }
  0x20   : > { %v608_v31 = vperm.slane %v476_v29, 2  ;;  %v609_v32 = vperm.slane %v476_v29, 6  ;;  %v610_v34 = vperm.slane %v477_v30, 2  ;;  %v611_v35 = vperm.slane %v477_v30, 6  ;;  %s1326_s23 = sshll.u32 %s434_s18, 2  ;;  %s1372_s29 = sshll.u32 %s1518_s12, 2 }
  0x21   : > { %v548_v36 = vperm.slane %v476_v29, 1  ;;  %v549_v37 = vperm.slane %v476_v29, 5  ;;  %v550_v38 = vperm.slane %v477_v30, 1  ;;  %v551_v39 = vperm.slane %v477_v30, 5  ;;  %s1172_s20 = scalar_lea.hbm %s1910_s9, %s1372_s29  ;;  %s436_s26 = scalar_lea.vmem [#allocation2], %s1326_s23 }
  0x22   : > { %v504_v41 = vperm.slane %v476_v29, 0  ;;  %v505_v42 = vperm.slane %v476_v29, 4  ;;  %v616_v43 = vperm.slane %v608_v31, 2  ;;  %v617_v44 = vperm.slane %v609_v32, 2  ;;  %s1174_s27 = sshll.u32 %s436_s26, 4  ;;  %s1176_s12 = sshll.u32 %s1172_s20, 4  ;;  %s1175_s27 = int_to_ptr.vmem [resolvable:$true] %s1174_s27  ;;  %s1177_s12 = int_to_ptr.hbm [resolvable:$true] %s1176_s12 }
  0x23   : > { %1444 = vset.pattern.permute.xlu2 %v1530_v2  ;;  %1440 = vset.pattern.permute.xlu0 %v1530_v2  ;;  %v506_v45 = vperm.slane %v477_v30, 0  ;;  %v507_v46 = vperm.slane %v477_v30, 4  ;;  %v1681_v47 = vperm.slane %v610_v34, 2  ;;  %v1683_v48 = vperm.slane %v611_v35, 2  ;;  %s1160_s28 = scalar_lea.sflag [#allocation3], %s434_s18  ;;  %s1462_s1 = sshra.s32 %s1177_s12, 4  ;;  %s1463_s1 = int_to_ptr.hbm [resolvable:$true] %s1462_s1 }
  0x24   : > { %1442 = vset.pattern.permute.xlu1 %v1529_v1  ;;  %499 = vperm.xlu0 %1440, %v481_v3   ;;  %v1685_v49 = vperm.slane %v548_v36, 1  ;;  %v1687_v50 = vperm.slane %v549_v37, 1  ;;  %v1689_v51 = vperm.slane %v550_v38, 1  ;;  %v1691_v52 = vperm.slane %v551_v39, 1  ;;  %s1464_s16 = scalar_lea.hbm %s1463_s1, 4  ;;  %s1468_s29 = scalar_lea.hbm %s1910_s9, 8 }
  0x25   : > { %541 = vperm.xlu1 %1442, %v480_v4   ;;  %489 = vperm.xlu2 %1444, %v479_v5   ;;  %v512_v54 = vperm.slane %v504_v41, 0  ;;  %v513_v55 = vperm.slane %v505_v42, 0  ;;  %v1693_v58 = vperm.slane %v506_v45, 0  ;;  %v1695_v59 = vperm.slane %v507_v46, 0  ;;  %p1465_p12 = scmp.ne.s32.totalorder %s1463_s1, %s1464_s16  ;;  %p1469_p1 = scmp.lt.s32.totalorder %s1463_s1, %s1910_s9 }
  0x26   : > { %p1470_p2 = scmp.lt.s32.totalorder %s1468_s29, %s1464_s16 }
  0x27   : > { %p1466_p13 = pnand %p1465_p12, %p1621_p4 }
  0x28   : > { %p1471_p3 = por %p1470_p2, %p1469_p1 }
  0x29   : > { %p1467_p0 = pneg %p1466_p13 }
  0x2b   : > { %p1472_p5 = pnand %p1471_p3, %p1467_p0 }
  0x2c   : > { %484 = vperm.xlu0 %1440, %v478_v6  }
  0x2d   : > { %537 = vperm.xlu1 %1442, %v479_v5   ;;  %1445 = vset.pattern.permute.xlu2 %v1528_v0 }
  0x2e   : > { %601 = vperm.xlu2 %1445, %v480_v4  }
  0x34   : > { %668 = vperm.xlu0 %1440, %v654_v7  }
  0x35   : > { %533 = vperm.xlu1 %1442, %v478_v6  }
  0x36   : > { %597 = vperm.xlu2 %1445, %v479_v5  }
  0x3c   : > { %733 = vperm.xlu0 %1440, %v715_v8  }
  0x3d   : > { %1446 = vset.pattern.permute.xlu1 %v1530_v2 }
  0x3e   : > { %593 = vperm.xlu2 %1445, %v478_v6   ;;  %673 = vperm.xlu1 %1446, %v655_v9  }
  0x44   : > { %718 = vperm.xlu0 %1440, %v712_v10  }
  0x46   : > { %1447 = vset.pattern.permute.xlu2 %v1530_v2  ;;  %663 = vperm.xlu1 %1446, %v653_v11  }
  0x47   : > { %658 = vperm.xlu2 %1447, %v652_v12  }
  0x4c   : > { %901 = vperm.xlu0 %1440, %v887_v13  }
  0x4e   : > { %728 = vperm.xlu1 %1446, %v714_v14  }
  0x4f   : > { %723 = vperm.xlu2 %1447, %v713_v15  }
  0x54   : > { %1064 = vperm.xlu0 %1440, %v1054_v16  }
  0x56   : > { %891 = vperm.xlu1 %1446, %v885_v17  }
  0x57   : > { %896 = vperm.xlu2 %1447, %v886_v18  }
  0x5c   : > { %1132 = vperm.xlu0 %1440, %v1129_v19  }
  0x5e   : > { %906 = vperm.xlu1 %1446, %v888_v20  }
  0x5f   : > { %1059 = vperm.xlu2 %1447, %v1053_v21  }
  0x66   : > { %1069 = vperm.xlu1 %1446, %v1055_v22  }
  0x67   : > { %1074 = vperm.xlu2 %1447, %v1056_v23  }
  0x75   : > { %v606_v24 = vpop.permute.xlu2 %605 }
  0x76   : > { %v632_v56 = vmul.f32 %v616_v43, %v606_v24  ;;  %v633_v57 = vmul.f32 %v617_v44, %v606_v24  ;;  %v634_v61 = vmul.f32 %v1681_v47, %v606_v24  ;;  %v635_v62 = vmul.f32 %v1683_v48, %v606_v24 }
  0x7f   : > { %v490_v25 = vpop.permute.xlu2 %489 }
  0x80   : > { %v520_v63 = vmul.f32 %v512_v54, %v490_v25  ;;  %v521_v0 = vmul.f32 %v513_v55, %v490_v25  ;;  %v522_v9 = vmul.f32 %v1693_v58, %v490_v25  ;;  %v523_v10 = vmul.f32 %v1695_v59, %v490_v25 }
  0x88   : > { %v602_v28 = vpop.permute.xlu2 %601 }
  0x89   : > { %v628_v11 = vmul.f32 %v616_v43, %v602_v28  ;;  %v629_v12 = vmul.f32 %v617_v44, %v602_v28  ;;  %v630_v14 = vmul.f32 %v1681_v47, %v602_v28  ;;  %v631_v15 = vmul.f32 %v1683_v48, %v602_v28 }
  0x8d   : > { %v546_v27 = vpop.permute.xlu0 %545 }
  0x8e   : > { %v1676_v26 = vpop.permute.xlu1 %494  ;;  %v572_v1 = vmul.f32 %v1685_v49, %v546_v27  ;;  %v573_v2 = vmul.f32 %v1687_v50, %v546_v27  ;;  %v574_v3 = vmul.f32 %v1689_v51, %v546_v27  ;;  %v575_v4 = vmul.f32 %v1691_v52, %v546_v27 }
  0x8f   : > { %v524_v16 = vmul.f32 %v512_v54, %v1676_v26  ;;  %v525_v17 = vmul.f32 %v513_v55, %v1676_v26  ;;  %v526_v27 = vmul.f32 %v1693_v58, %v1676_v26  ;;  %v527_v28 = vmul.f32 %v1695_v59, %v1676_v26 }
  0x90   : > { %v598_v53 = vpop.permute.xlu2 %597 }
  0x91   : > { %v624_v29 = vmul.f32 %v616_v43, %v598_v53  ;;  %v1719_v30 = vmul.f32 %v617_v44, %v598_v53  ;;  %v1722_v34 = vmul.f32 %v1681_v47, %v598_v53 }
  0x96   : > { %v500_v40 = vpop.permute.xlu0 %499 }
  0x97   : > { %v542_v33 = vpop.permute.xlu1 %541  ;;  %v528_v5 = vmul.f32 %v512_v54, %v500_v40  ;;  %v529_v6 = vmul.f32 %v513_v55, %v500_v40  ;;  %v530_v7 = vmul.f32 %v1693_v58, %v500_v40  ;;  %v531_v8 = vmul.f32 %v1695_v59, %v500_v40 }
  0x98   : > { %v568_v18 = vmul.f32 %v1685_v49, %v542_v33  ;;  %v569_v19 = vmul.f32 %v1687_v50, %v542_v33  ;;  %v570_v20 = vmul.f32 %v1689_v51, %v542_v33  ;;  %v571_v21 = vmul.f32 %v1691_v52, %v542_v33  ;;  %v594_v31 = vpop.permute.xlu2 %593 }
  0x99   : > { %v588_v22 = vadd.f32 %v572_v1, %v528_v5  ;;  %v589_v23 = vadd.f32 %v573_v2, %v529_v6  ;;  %v590_v24 = vadd.f32 %v574_v3, %v530_v7  ;;  %v591_v25 = vadd.f32 %v575_v4, %v531_v8 }
  0x9a   : > { %v1725_v33 = vmul.f32 %v1683_v48, %v598_v53  ;;  %v620_v35 = vmul.f32 %v616_v43, %v594_v31  ;;  %v621_v36 = vmul.f32 %v617_v44, %v594_v31  ;;  %v584_v37 = vadd.f32 %v568_v18, %v524_v16 }
  0x9b   : > { %v585_v38 = vadd.f32 %v569_v19, %v525_v17  ;;  %v586_v39 = vadd.f32 %v570_v20, %v526_v27  ;;  %v587_v40 = vadd.f32 %v571_v21, %v527_v28  ;;  %v648_v41 = vadd.f32 %v632_v56, %v588_v22 }
  0x9c   : > { %v649_v42 = vadd.f32 %v633_v57, %v589_v23  ;;  %v650_v26 = vadd.f32 %v634_v61, %v590_v24  ;;  %v651_v45 = vadd.f32 %v635_v62, %v591_v25  ;;  %v644_v6 = vadd.f32 %v628_v11, %v584_v37 }
  0x9d   : > { %v645_v56 = vadd.f32 %v629_v12, %v585_v38  ;;  %v646_v57 = vadd.f32 %v630_v14, %v586_v39  ;;  %v647_v61 = vadd.f32 %v631_v15, %v587_v40  ;;  %v622_v20 = vmul.f32 %v1681_v47, %v594_v31 }
  0x9e   : > { %v485_v13 = vpop.permute.xlu0 %484  ;;  %v623_v21 = vmul.f32 %v1683_v48, %v594_v31 }
  0x9f   : > { %v538_v60 = vpop.permute.xlu1 %537  ;;  %v516_v53 = vmul.f32 %v512_v54, %v485_v13  ;;  %v517_v4 = vmul.f32 %v513_v55, %v485_v13  ;;  %v518_v62 = vmul.f32 %v1693_v58, %v485_v13  ;;  %v519_v7 = vmul.f32 %v1695_v59, %v485_v13 }
  0xa0   : > { %v564_v46 = vmul.f32 %v1685_v49, %v538_v60  ;;  %v565_v1 = vmul.f32 %v1687_v50, %v538_v60  ;;  %v566_v2 = vmul.f32 %v1689_v51, %v538_v60  ;;  %v567_v3 = vmul.f32 %v1691_v52, %v538_v60 }
  0xa1   : > { %v659_v47 = vpop.permute.xlu2 %658 }
  0xa2   : > { %v580_v60 = vadd.f32 %v564_v46, %v520_v63  ;;  %v581_v54 = vadd.f32 %v565_v1, %v521_v0  ;;  %v582_v55 = vadd.f32 %v566_v2, %v522_v9  ;;  %v583_v17 = vadd.f32 %v567_v3, %v523_v10 }
  0xa4   : > { %v640_v27 = vadd.f32 %v624_v29, %v580_v60  ;;  %v641_v48 = vadd.f32 %v1719_v30, %v581_v54  ;;  %v642_v31 = vadd.f32 %v1722_v34, %v582_v55 }
  0xa6   : > { %v669_v5 = vpop.permute.xlu0 %668 }
  0xa7   : > { %v534_v32 = vpop.permute.xlu1 %533  ;;  %v1737_v18 = vadd.f32 %v669_v5, %v644_v6  ;;  %v1751_v63 = vadd.f32 %v669_v5, %v647_v61  ;;  %v711_v6 = vld [vmem:[%s461_s25 + $0x18] sm:$0xff] }
  0xa8   : > { %v560_v43 = vmul.f32 %v1685_v49, %v534_v32  ;;  %v561_v44 = vmul.f32 %v1687_v50, %v534_v32  ;;  %v562_v8 = vmul.f32 %v1689_v51, %v534_v32  ;;  %v563_v16 = vmul.f32 %v1691_v52, %v534_v32 }
  0xa9   : > { %v1739_v50 = vadd.f32 %v669_v5, %v645_v56  ;;  %v1749_v52 = vadd.f32 %v669_v5, %v646_v57  ;;  %v700_v24 = vmax.f32 %v1737_v18, 0.0  ;;  %v703_v32 = vmax.f32 %v1751_v63, 0.0  ;;  %v710_v5 = vld [vmem:[%s461_s25 + $0x10] sm:$0xff] }
  0xaa   : > { %v576_v11 = vadd.f32 %v560_v43, %v516_v53  ;;  %v577_v12 = vadd.f32 %v561_v44, %v517_v4  ;;  %v578_v0 = vadd.f32 %v562_v8, %v518_v62  ;;  %v579_v9 = vadd.f32 %v563_v16, %v519_v7  ;;  %v708_v43 = vld [vmem:[%s461_s25] sm:$0xff]  ;;  %v709_v44 = vld [vmem:[%s461_s25 + $0x8] sm:$0xff] }
  0xab   : > { %v701_v25 = vmax.f32 %v1739_v50, 0.0  ;;  %v702_v28 = vmax.f32 %v1749_v52, 0.0 }
  0xac   : > { %v636_v22 = vadd.f32 %v620_v35, %v576_v11  ;;  %v637_v23 = vadd.f32 %v621_v36, %v577_v12  ;;  %v638_v37 = vadd.f32 %v622_v20, %v578_v0  ;;  %v639_v38 = vadd.f32 %v623_v21, %v579_v9  ;;  %v724_v20 = vpop.permute.xlu2 %723 }
  0xad   : > { %v643_v35 = vadd.f32 %v1725_v33, %v583_v17 }
  0xae   : > { %v1766_v36 = vadd.f32 %v659_v47, %v636_v22  ;;  %v1768_v39 = vadd.f32 %v659_v47, %v637_v23  ;;  %v1778_v30 = vadd.f32 %v659_v47, %v638_v37  ;;  %v1780_v34 = vadd.f32 %v659_v47, %v639_v38  ;;  %v734_v17 = vpop.permute.xlu0 %733 }
  0xb0   : > { %v674_v49 = vpop.permute.xlu1 %673  ;;  %v692_v2 = vmax.f32 %v1766_v36, 0.0  ;;  %v693_v3 = vmax.f32 %v1768_v39, 0.0  ;;  %v694_v53 = vmax.f32 %v1778_v30, 0.0  ;;  %v695_v4 = vmax.f32 %v1780_v34, 0.0 }
  0xb1   : > { %v1741_v14 = vadd.f32 %v674_v49, %v648_v41  ;;  %v1743_v58 = vadd.f32 %v674_v49, %v649_v42  ;;  %v1745_v59 = vadd.f32 %v674_v49, %v650_v26  ;;  %v1747_v51 = vadd.f32 %v674_v49, %v651_v45 }
  0xb3   : > { %v704_v10 = vmax.f32 %v1741_v14, 0.0  ;;  %v705_v13 = vmax.f32 %v1743_v58, 0.0  ;;  %v706_v15 = vmax.f32 %v1745_v59, 0.0  ;;  %v707_v19 = vmax.f32 %v1747_v51, 0.0 }
  0xb5   : > { %761 = vmatpush.msra.mxu0 %v704_v10  ;;  %790 = vmatpush.msra.mxu1 %v705_v13 }
  0xb6   : > { %819 = vmatpush.msra.mxu2 %v706_v15  ;;  %848 = vmatpush.msra.mxu3 %v707_v19 }
  0xb7   : > { %762 = vmatpush.msra.mxu0 %v700_v24  ;;  %791 = vmatpush.msra.mxu1 %v701_v25  ;;  %v719_v25 = vpop.permute.xlu0 %718 }
  0xb8   : > { %820 = vmatpush.msra.mxu2 %v702_v28  ;;  %849 = vmatpush.msra.mxu3 %v703_v32  ;;  %v664_v29 = vpop.permute.xlu1 %663 }
  0xb9   : > { %v1770_v40 = vadd.f32 %v664_v29, %v640_v27  ;;  %v1772_v41 = vadd.f32 %v664_v29, %v641_v48  ;;  %v1774_v42 = vadd.f32 %v664_v29, %v642_v31  ;;  %v1776_v26 = vadd.f32 %v664_v29, %v643_v35 }
  0xbb   : > { %v696_v33 = vmax.f32 %v1770_v40, 0.0  ;;  %v697_v45 = vmax.f32 %v1772_v41, 0.0  ;;  %v698_v46 = vmax.f32 %v1774_v42, 0.0  ;;  %v699_v1 = vmax.f32 %v1776_v26, 0.0 }
  0xbd   : > { %763 = vmatpush.msra.mxu0 %v696_v33  ;;  %792 = vmatpush.msra.mxu1 %v697_v45 }
  0xbe   : > { %821 = vmatpush.msra.mxu2 %v698_v46  ;;  %850 = vmatpush.msra.mxu3 %v699_v1 }
  0xbf   : > { %764 = vmatpush.msra.mxu0 %v692_v2  ;;  %793 = vmatpush.msra.mxu1 %v693_v3 }
  0xc0   : > { %822 = vmatpush.msra.mxu2 %v694_v53  ;;  %851 = vmatpush.msra.mxu3 %v695_v4  ;;  %v729_v49 = vpop.permute.xlu1 %728 }
  0xc1   : > { %1339 = vmatmul.msk.f32.vlgmr.msra.gmra.mxu0 %vm736_vm0, %v708_v43  ;;  %1343 = vmatmul.msk.f32.vlgmr.msra.gmra.mxu1 %vm736_vm0, %v708_v43 }
  0xc2   : > { %1347 = vmatmul.msk.f32.vlgmr.msra.gmra.mxu2 %vm736_vm0, %v708_v43  ;;  %1351 = vmatmul.msk.f32.vlgmr.msra.gmra.mxu3 %vm736_vm0, %v708_v43  ;;  %v881_v43 = vld [vmem:[%s1906_s5] sm:$0xff] }
  0xc9   : > { %1340 = vmatmul.msk.f32.gmra.mxu0 %vm736_vm0, %v709_v44  ;;  %1344 = vmatmul.msk.f32.gmra.mxu1 %vm736_vm0, %v709_v44 }
  0xca   : > { %1348 = vmatmul.msk.f32.gmra.mxu2 %vm736_vm0, %v709_v44  ;;  %1352 = vmatmul.msk.f32.gmra.mxu3 %vm736_vm0, %v709_v44 }
  0xd1   : > { %1341 = vmatmul.msk.f32.gmra.mxu0 %vm736_vm0, %v710_v5  ;;  %1345 = vmatmul.msk.f32.gmra.mxu1 %vm736_vm0, %v710_v5 }
  0xd2   : > { %1349 = vmatmul.msk.f32.gmra.mxu2 %vm736_vm0, %v710_v5  ;;  %1353 = vmatmul.msk.f32.gmra.mxu3 %vm736_vm0, %v710_v5 }
  0xd9   : > { %1342 = vmatmul.msk.f32.gmra.mxu0 %vm736_vm0, %v711_v6  ;;  %1346 = vmatmul.msk.f32.gmra.mxu1 %vm736_vm0, %v711_v6 }
  0xda   : > { %1350 = vmatmul.msk.f32.gmra.mxu2 %vm736_vm0, %v711_v6  ;;  %1354 = vmatmul.msk.f32.gmra.mxu3 %vm736_vm0, %v711_v6 }
 0x13e   : > { %v766_v56 = vpop.f32.mrf.mxu0  ;;  %v795_v57 = vpop.f32.mrf.mxu1 }
 0x13f   : > { %v767_v27 = vadd.f32 %v766_v56, %v719_v25  ;;  %v796_v28 = vadd.f32 %v795_v57, %v719_v25 }
 0x141   : > { %v865_v46 = vmax.f32 %v767_v27, 0.0  ;;  %v866_v1 = vmax.f32 %v796_v28, 0.0 }
 0x145   : > { %v824_v61 = vpop.f32.mrf.mxu2  ;;  %v853_v62 = vpop.f32.mrf.mxu3 }
 0x146   : > { %v769_v7 = vpop.f32.mrf.mxu0  ;;  %v798_v8 = vpop.f32.mrf.mxu1  ;;  %v825_v44 = vadd.f32 %v824_v61, %v719_v25  ;;  %v854_v5 = vadd.f32 %v853_v62, %v719_v25  ;;  %v882_v61 = vld [vmem:[%s1906_s5 + $0x8] sm:$0xff]  ;;  %v883_v62 = vld [vmem:[%s1906_s5 + $0x10] sm:$0xff] }
 0x147   : > { %v770_v21 = vadd.f32 %v769_v7, %v724_v20  ;;  %v799_v22 = vadd.f32 %v798_v8, %v724_v20 }
 0x148   : > { %v867_v8 = vmax.f32 %v825_v44, 0.0 }
 0x149   : > { %v869_v38 = vmax.f32 %v770_v21, 0.0  ;;  %v870_v47 = vmax.f32 %v799_v22, 0.0 }
 0x14d   : > { %v827_v16 = vpop.f32.mrf.mxu2  ;;  %v856_v60 = vpop.f32.mrf.mxu3 }
 0x14e   : > { %v772_v54 = vpop.f32.mrf.mxu0  ;;  %v801_v55 = vpop.f32.mrf.mxu1  ;;  %v828_v2 = vadd.f32 %v827_v16, %v724_v20  ;;  %v857_v3 = vadd.f32 %v856_v60, %v724_v20  ;;  %v868_v16 = vmax.f32 %v854_v5, 0.0  ;;  %v884_v60 = vld [vmem:[%s1906_s5 + $0x18] sm:$0xff] }
 0x14f   : > { %v773_v10 = vadd.f32 %v772_v54, %v729_v49  ;;  %v802_v13 = vadd.f32 %v801_v55, %v729_v49 }
 0x150   : > { %v871_v57 = vmax.f32 %v828_v2, 0.0  ;;  %v872_v7 = vmax.f32 %v857_v3, 0.0 }
 0x151   : > { %v873_v32 = vmax.f32 %v773_v10, 0.0  ;;  %v874_v37 = vmax.f32 %v802_v13, 0.0 }
 0x155   : > { %v830_v11 = vpop.f32.mrf.mxu2  ;;  %v859_v12 = vpop.f32.mrf.mxu3 }
 0x156   : > { %v775_v0 = vpop.f32.mrf.mxu0  ;;  %v804_v9 = vpop.f32.mrf.mxu1  ;;  %v831_v35 = vadd.f32 %v830_v11, %v729_v49  ;;  %v860_v29 = vadd.f32 %v859_v12, %v729_v49 }
 0x157   : > { %v776_v15 = vadd.f32 %v775_v0, %v734_v17  ;;  %v805_v19 = vadd.f32 %v804_v9, %v734_v17  ;;  %v897_v49 = vpop.permute.xlu2 %896  ;;  %v902_v0 = vpop.permute.xlu0 %901 }
 0x158   : > { %v875_v6 = vmax.f32 %v831_v35, 0.0  ;;  %v876_v56 = vmax.f32 %v860_v29, 0.0 }
 0x159   : > { %v877_v23 = vmax.f32 %v776_v15, 0.0  ;;  %v878_v24 = vmax.f32 %v805_v19, 0.0 }
 0x15b   : > { %933 = vmatpush.msrb.mxu0 %v877_v23  ;;  %962 = vmatpush.msrb.mxu1 %v878_v24 }
 0x15d   : > { %v833_v48 = vpop.f32.mrf.mxu2  ;;  %v862_v31 = vpop.f32.mrf.mxu3  ;;  %934 = vmatpush.msrb.mxu0 %v873_v32  ;;  %963 = vmatpush.msrb.mxu1 %v874_v37 }
 0x15e   : > { %v834_v33 = vadd.f32 %v833_v48, %v734_v17  ;;  %v863_v45 = vadd.f32 %v862_v31, %v734_v17  ;;  %v892_v17 = vpop.permute.xlu1 %891 }
 0x15f   : > { %935 = vmatpush.msrb.mxu0 %v869_v38  ;;  %964 = vmatpush.msrb.mxu1 %v870_v47  ;;  %v1060_v24 = vpop.permute.xlu2 %1059  ;;  %v1065_v29 = vpop.permute.xlu0 %1064 }
 0x160   : > { %v879_v53 = vmax.f32 %v834_v33, 0.0  ;;  %v880_v4 = vmax.f32 %v863_v45, 0.0 }
 0x161   : > { %936 = vmatpush.msrb.mxu0 %v865_v46  ;;  %965 = vmatpush.msrb.mxu1 %v866_v1 }
 0x162   : > { %991 = vmatpush.msrb.mxu2 %v879_v53  ;;  %1020 = vmatpush.msrb.mxu3 %v880_v4 }
 0x163   : > { %1355 = vmatmul.msk.f32.vlgmr.msrb.gmra.mxu0 %vm736_vm0, %v881_v43  ;;  %1359 = vmatmul.msk.f32.vlgmr.msrb.gmra.mxu1 %vm736_vm0, %v881_v43 }
 0x164   : > { %992 = vmatpush.msrb.mxu2 %v875_v6  ;;  %1021 = vmatpush.msrb.mxu3 %v876_v56 }
 0x166   : > { %993 = vmatpush.msrb.mxu2 %v871_v57  ;;  %1022 = vmatpush.msrb.mxu3 %v872_v7  ;;  %v1838_v13 = vpop.permute.xlu1 %906 }
 0x168   : > { %994 = vmatpush.msrb.mxu2 %v867_v8  ;;  %1023 = vmatpush.msrb.mxu3 %v868_v16 }
 0x169   : > { %1363 = vmatmul.msk.f32.vlgmr.msrb.gmra.mxu2 %vm736_vm0, %v881_v43  ;;  %1367 = vmatmul.msk.f32.vlgmr.msrb.gmra.mxu3 %vm736_vm0, %v881_v43 }
 0x16b   : > { %1356 = vmatmul.msk.f32.gmra.mxu0 %vm736_vm0, %v882_v61  ;;  %1360 = vmatmul.msk.f32.gmra.mxu1 %vm736_vm0, %v882_v61 }
 0x16e   : > { %v1070_v46 = vpop.permute.xlu1 %1069 }
 0x171   : > { %1364 = vmatmul.msk.f32.gmra.mxu2 %vm736_vm0, %v882_v61  ;;  %1368 = vmatmul.msk.f32.gmra.mxu3 %vm736_vm0, %v882_v61 }
 0x173   : > { %1357 = vmatmul.msk.f32.gmra.mxu0 %vm736_vm0, %v883_v62  ;;  %1361 = vmatmul.msk.f32.gmra.mxu1 %vm736_vm0, %v883_v62 }
 0x179   : > { %1365 = vmatmul.msk.f32.gmra.mxu2 %vm736_vm0, %v883_v62  ;;  %1369 = vmatmul.msk.f32.gmra.mxu3 %vm736_vm0, %v883_v62 }
 0x17b   : > { %1358 = vmatmul.msk.f32.gmra.mxu0 %vm736_vm0, %v884_v60  ;;  %1362 = vmatmul.msk.f32.gmra.mxu1 %vm736_vm0, %v884_v60 }
 0x181   : > { %1366 = vmatmul.msk.f32.gmra.mxu2 %vm736_vm0, %v884_v60  ;;  %1370 = vmatmul.msk.f32.gmra.mxu3 %vm736_vm0, %v884_v60 }
 0x1e0   : > { %v938_v54 = vpop.f32.mrf.mxu0  ;;  %v967_v55 = vpop.f32.mrf.mxu1 }
 0x1e1   : > { %v939_v20 = vadd.f32 %v938_v54, %v892_v17  ;;  %v968_v21 = vadd.f32 %v967_v55, %v892_v17 }
 0x1e3   : > { %v1037_v37 = vadd.f32 %v939_v20, %v1766_v36  ;;  %v1038_v38 = vadd.f32 %v968_v21, %v1768_v39 }
 0x1e5   : > { %v1077_v1 = vmul.f32 %v1060_v24, %v1037_v37  ;;  %v1078_v2 = vmul.f32 %v1060_v24, %v1038_v38 }
 0x1e8   : > { %v941_v11 = vpop.f32.mrf.mxu0  ;;  %v970_v12 = vpop.f32.mrf.mxu1 }
 0x1e9   : > { %v942_v15 = vadd.f32 %v941_v11, %v897_v49  ;;  %v971_v19 = vadd.f32 %v970_v12, %v897_v49 }
 0x1eb   : > { %v1041_v28 = vadd.f32 %v942_v15, %v1770_v40  ;;  %v1042_v32 = vadd.f32 %v971_v19, %v1772_v41 }
 0x1ec   : > { %v996_v9 = vpop.f32.mrf.mxu2  ;;  %v1025_v10 = vpop.f32.mrf.mxu3 }
 0x1ed   : > { %v1081_v33 = vmul.f32 %v1065_v29, %v1041_v28  ;;  %v1082_v45 = vmul.f32 %v1065_v29, %v1042_v32  ;;  %v997_v56 = vadd.f32 %v996_v9, %v892_v17  ;;  %v1026_v57 = vadd.f32 %v1025_v10, %v892_v17 }
 0x1ef   : > { %v1093_v4 = vadd.f32 %v1081_v33, %v1077_v1 }
 0x1f0   : > { %v944_v22 = vpop.f32.mrf.mxu0  ;;  %v973_v23 = vpop.f32.mrf.mxu1 }
 0x1f1   : > { %v945_v25 = vadd.f32 %v944_v22, %v902_v0  ;;  %v974_v27 = vadd.f32 %v973_v23, %v902_v0 }
 0x1f3   : > { %v1045_v47 = vadd.f32 %v945_v25, %v1737_v18  ;;  %v1046_v48 = vadd.f32 %v974_v27, %v1739_v50  ;;  %v1102_v18 = vadd.f32 %v1082_v45, %v1078_v2  ;;  %v1075_v50 = vpop.permute.xlu2 %1074 }
 0x1f4   : > { %v999_v31 = vpop.f32.mrf.mxu2  ;;  %v1028_v35 = vpop.f32.mrf.mxu3 }
 0x1f5   : > { %v1085_v3 = vmul.f32 %v1070_v46, %v1045_v47  ;;  %v1086_v40 = vmul.f32 %v1070_v46, %v1046_v48  ;;  %v1000_v43 = vadd.f32 %v999_v31, %v897_v49  ;;  %v1029_v44 = vadd.f32 %v1028_v35, %v897_v49 }
 0x1f7   : > { %v1094_v7 = vadd.f32 %v1093_v4, %v1085_v3  ;;  %v1103_v8 = vadd.f32 %v1102_v18, %v1086_v40  ;;  %v1043_v11 = vadd.f32 %v1000_v43, %v1774_v42  ;;  %v1044_v12 = vadd.f32 %v1029_v44, %v1776_v26 }
 0x1f8   : > { %v947_v53 = vpop.f32.mrf.mxu0  ;;  %v976_v41 = vpop.f32.mrf.mxu1 }
 0x1f9   : > { %v948_v36 = vadd.f32 %v947_v53, %v1838_v13  ;;  %v977_v39 = vadd.f32 %v976_v41, %v1838_v13  ;;  %v1083_v19 = vmul.f32 %v1065_v29, %v1043_v11  ;;  %v1084_v20 = vmul.f32 %v1065_v29, %v1044_v12 }
 0x1fb   : > { %v1049_v5 = vadd.f32 %v948_v36, %v1741_v14  ;;  %v1050_v6 = vadd.f32 %v977_v39, %v1743_v58  ;;  %v1039_v14 = vadd.f32 %v997_v56, %v1778_v30  ;;  %v1040_v58 = vadd.f32 %v1026_v57, %v1780_v34 }
 0x1fc   : > { %v1002_v16 = vpop.f32.mrf.mxu2  ;;  %v1031_v61 = vpop.f32.mrf.mxu3  ;;  %v1154_v57 = vlaneseq }
 0x1fd   : > { %v1089_v62 = vmul.f32 %v1075_v50, %v1049_v5  ;;  %v1090_v60 = vmul.f32 %v1075_v50, %v1050_v6  ;;  %v1003_v54 = vadd.f32 %v1002_v16, %v902_v0  ;;  %v1032_v55 = vadd.f32 %v1031_v61, %v902_v0 }
 0x1fe   : > { %v1079_v0 = vmul.f32 %v1060_v24, %v1039_v14  ;;  %v1080_v23 = vmul.f32 %v1060_v24, %v1040_v58  ;;  %vm1156_vm4 = vcmp.lt.s32.totalorder %v1154_v57, 512 }
 0x1ff   : > { %v1095_v15 = vadd.f32 %v1094_v7, %v1089_v62  ;;  %v1104_v49 = vadd.f32 %v1103_v8, %v1090_v60  ;;  %v1047_v17 = vadd.f32 %v1003_v54, %v1749_v52  ;;  %v1048_v10 = vadd.f32 %v1032_v55, %v1751_v63 }
 0x200   : > { %v1111_v32 = vadd.f32 %v1083_v19, %v1079_v0  ;;  %v1120_v52 = vadd.f32 %v1084_v20, %v1080_v23 }
 0x201   : > { %v1105_v9 = vrot.slane %v1104_v49, 4  ;;  %v1096_v21 = vrot.slane %v1095_v15, 4  ;;  %v1087_v42 = vmul.f32 %v1070_v46, %v1047_v17  ;;  %v1088_v28 = vmul.f32 %v1070_v46, %v1048_v10 }
 0x203   : > { %v1106_v22 = vadd.f32 %v1105_v9, %v1104_v49  ;;  %v1097_v37 = vadd.f32 %v1096_v21, %v1095_v15  ;;  %v1112_v47 = vadd.f32 %v1111_v32, %v1087_v42  ;;  %v1121_v31 = vadd.f32 %v1120_v52, %v1088_v28 }
 0x204   : > { %v1005_v25 = vpop.f32.mrf.mxu2  ;;  %v1034_v26 = vpop.f32.mrf.mxu3 }
 0x205   : > { %v1107_v27 = vrot.slane %v1106_v22, 2  ;;  %v1006_v30 = vadd.f32 %v1005_v25, %v1838_v13  ;;  %v1035_v34 = vadd.f32 %v1034_v26, %v1838_v13  ;;  %v1098_v29 = vrot.slane %v1097_v37, 2 }
 0x207   : > { %v1051_v63 = vadd.f32 %v1006_v30, %v1745_v59  ;;  %v1052_v38 = vadd.f32 %v1035_v34, %v1747_v51  ;;  %v1108_v48 = vadd.f32 %v1107_v27, %v1106_v22  ;;  %v1099_v2 = vadd.f32 %v1098_v29, %v1097_v37  ;;  %v1133_v59 = vpop.permute.xlu0 %1132 }
 0x208   : > { %v1135_v36 = vperm.slane %v1133_v59, 0 }
 0x209   : > { %v1091_v24 = vmul.f32 %v1075_v50, %v1051_v63  ;;  %v1092_v35 = vmul.f32 %v1075_v50, %v1052_v38  ;;  %v1109_v46 = vrot.slane %v1108_v48, 1  ;;  %v1100_v39 = vrot.slane %v1099_v2, 1 }
 0x20b   : > { %v1113_v33 = vadd.f32 %v1112_v47, %v1091_v24  ;;  %v1122_v45 = vadd.f32 %v1121_v31, %v1092_v35  ;;  %v1110_v53 = vadd.f32 %v1109_v46, %v1108_v48  ;;  %v1101_v5 = vadd.f32 %v1100_v39, %v1099_v2 }
 0x20d   : > { %v1114_v13 = vrot.slane %v1113_v33, 4  ;;  %v1123_v1 = vrot.slane %v1122_v45, 4  ;;  %v1137_v44 = vadd.f32 %v1135_v36, %v1110_v53  ;;  %v1136_v61 = vadd.f32 %v1135_v36, %v1101_v5 }
 0x20f   : > { %v1115_v3 = vadd.f32 %v1114_v13, %v1113_v33  ;;  %v1124_v40 = vadd.f32 %v1123_v1, %v1122_v45  ;;  %v1144_v16 = vrot.slane %v1137_v44, 7 }
 0x211   : > { %v1116_v51 = vrot.slane %v1115_v3, 2  ;;  %v1125_v41 = vrot.slane %v1124_v40, 2  ;;  %v1148_v54 = vsel %vm1147_vm1, %v1136_v61, %v1144_v16 }
 0x213   : > { %v1117_v4 = vadd.f32 %v1116_v51, %v1115_v3  ;;  %v1126_v18 = vadd.f32 %v1125_v41, %v1124_v40 }
 0x215   : > { %v1118_v43 = vrot.slane %v1117_v4, 1  ;;  %v1127_v50 = vrot.slane %v1126_v18, 1 }
 0x217   : > { %v1119_v6 = vadd.f32 %v1118_v43, %v1117_v4  ;;  %v1128_v56 = vadd.f32 %v1127_v50, %v1126_v18 }
 0x219   : > { %v1138_v7 = vadd.f32 %v1135_v36, %v1119_v6  ;;  %v1139_v8 = vadd.f32 %v1135_v36, %v1128_v56 }
 0x21b   : > { %v1145_v62 = vrot.slane %v1138_v7, 6  ;;  %v1146_v60 = vrot.slane %v1139_v8, 5 }
 0x21d   : > { %v1150_v55 = vsel %vm1149_vm2, %v1145_v62, %v1146_v60 }
 0x21e   : > { %v1152_v11 = vsel %vm1151_vm3, %v1148_v54, %v1150_v55 }
 0x21f   : > { %1158 = vst.msk [vmem:[%s436_s26] sm:$0xf] %vm1156_vm4, %v1152_v11 }
 0x220   : > { %1475 = shalt.err (!%p1472_p5)
}
 0x221   : > { %1381 = dma.vmem_to_hbm [thread:$0]  (%p1621_p4), %s1175_s27, 64, %s1177_s12, %s1160_s28  }
 0x222 PF: > { %p1387_p6 = scmp.ge.s32.totalorder %s1526_s14, 2  ;;  %s1188_s18 = sand.u32 1, %s1506_s30  }
 0x223   : > { %s1189_s20 = scalar_lea.sflag [#allocation3], %s1188_s18 }
 0x224   : > { %p1384_p7 = pnand %p1387_p6, %p1628_p8 }
 0x226   : > { %p1385_p9 = pneg %p1384_p7 }
 0x228   : > { %1501 = dma.done.wait (%p1385_p9), %s1189_s20, 64  }
 0x229   : > { %1503 = vsyncadd (%p1385_p9), %s1189_s20, 4294967232  ;;  %s22_s14 = sadd.s32 1, %s1526_s14   ;;  %s1915_s30 = smov %s1510_s10 }
 0x22a   : > { %p19_p10 = scmp.ge.s32.totalorder %s22_s14, 4   ;;  %s1916_s10 = smov %s1514_s11 }
 0x22b   : > { %s1917_s11 = smov %s1634_s22  ;;  %s1918_s12 = smov %s1522_s13 }
 0x22c   : > { %s1919_s13 = smov %s1921_s17  ;;  %21 = sbr.rel (!%p19_p10) target bundleno = 6 (0x6), region = 109 }
 0x231   :  { %1195 = vsyncpa [#allocation3], 1 }
 0x232   :  { %1197 = vsyncpa [#allocation3 + $0x1], 1 }

</bundles_post_ra>
